<compile_context>
chip_gen: v6e
topology: v6e:2x2x1
jax: 0.10.0
libtpu: 0.0.40
codegen_flags: <defaults>
</compile_context>

<pallas_src>
import functools

import jax
import jax.numpy as jnp
from jax.experimental import pallas as pl
from jax.experimental.pallas import tpu as pltpu


_VMEM_LIMIT = 32 * 1024 * 1024  # explicit scoped-VMEM cap; tiles budgeted well below


def _round_up(x, m):
    return (x + m - 1) // m * m


def _cdiv(a, b):
    return -(-a // b)


# --------------------------- encoder kernel ---------------------------------
# enc[i] = sum_k x[i, k-tile] @ W_e[k-tile, :] + b        (f32 accumulate)
def _encoder_kernel(x_ref, we_ref, be_ref, enc_ref, acc_ref, *, d_in, tk, mask_k):
    k = pl.program_id(1)

    @pl.when(k == 0)
    def _():
        acc_ref[...] = jnp.zeros_like(acc_ref)

    x = x_ref[...]
    we = we_ref[...]
    if mask_k:
        # The last K tile is ragged; Pallas does not zero the out-of-bounds part
        # of partial input blocks, so zero BOTH operands' tails before the dot.
        col = k * tk + jax.lax.broadcasted_iota(jnp.int32, x.shape, 1)
        x = jnp.where(col < d_in, x, 0)
        row = k * tk + jax.lax.broadcasted_iota(jnp.int32, we.shape, 0)
        we = jnp.where(row < d_in, we, 0)

    acc_ref[...] += jnp.dot(
        x.astype(we.dtype), we, preferred_element_type=jnp.float32
    )

    @pl.when(k == pl.num_programs(1) - 1)
    def _():
        enc_ref[...] = (acc_ref[...] + be_ref[...]).astype(enc_ref.dtype)


# --------------------------- decoder kernel ---------------------------------
# dec[i, j] = enc[i] @ W_d[:, j-tile]          (no bias)
def _decoder_kernel(enc_ref, wd_ref, dec_ref):
    dec_ref[...] = jnp.dot(
        enc_ref[...].astype(wd_ref.dtype), wd_ref[...],
        preferred_element_type=jnp.float32,
    ).astype(dec_ref.dtype)


def prepare_params(w_enc_t, b_enc, w_dec_t, *, compute_dtype=jnp.bfloat16):
    """One-time weight preparation (do NOT put this in the per-forward path).

    w_enc_t: [D_IN, HID] (= W_e^T), b_enc: [HID], w_dec_t: [HID, D_OUT] (= W_d^T).
    Returns bf16 weights + f32 (1, HID) bias.
    """
    return (
        w_enc_t.astype(compute_dtype),
        b_enc.reshape(1, -1).astype(jnp.float32),
        w_dec_t.astype(compute_dtype),
    )


def autoencoder_forward(x, w_enc_t, b_enc2d, w_dec_t, *, tb=512, tk=4096, tn=2048):
    """x: [B, D_IN]; w_enc_t: [D_IN, HID] (bf16, from prepare_params);
    b_enc2d: [1, HID] f32; w_dec_t: [HID, D_OUT] (bf16).
    Returns (encoded [B, HID], decoded [B, D_OUT]) in x.dtype."""
    B, D_in = x.shape
    HID = w_enc_t.shape[1]
    D_out = w_dec_t.shape[1]
    out_dtype = x.dtype

    # ---- tile sizes: full-dim blocks when the dim fits, aligned tiles otherwise ----
    if B <= tb:
        tb = B                        # block == full dim -> always legal
    else:
        tb = _round_up(tb, 16)        # 16 keeps bf16/f32 sublane packing happy
    if D_in <= tk:
        tk = D_in
    else:
        tk = _round_up(tk, 128)
    if D_out <= tn:
        tn = D_out
    else:
        tn = _round_up(tn, 128)

    n_i = _cdiv(B, tb)
    n_k = _cdiv(D_in, tk)
    n_j = _cdiv(D_out, tn)
    mask_k = (D_in % tk) != 0

    # ---------------- phase 1: encoder  (grid = batch tiles x K tiles) ----------------
    enc_kernel = functools.partial(_encoder_kernel, d_in=D_in, tk=tk, mask_k=mask_k)
    encoded = pl.pallas_call(
        enc_kernel,
        out_shape=jax.ShapeDtypeStruct((B, HID), out_dtype),
        grid_spec=pltpu.PrefetchScalarGridSpec(
            num_scalar_prefetch=0,
            grid=(n_i, n_k),
            in_specs=[
                pl.BlockSpec((tb, tk), lambda i, k: (i, k)),    # x tile (native dtype)
                pl.BlockSpec((tk, HID), lambda i, k: (k, 0)),   # W_e tile (unpadded HID)
                pl.BlockSpec((1, HID), lambda i, k: (0, 0)),    # bias, resident
            ],
            out_specs=pl.BlockSpec((tb, HID), lambda i, k: (i, 0)),
            scratch_shapes=[pltpu.VMEM((tb, HID), jnp.float32)],
        ),
        compiler_params=pltpu.CompilerParams(
            dimension_semantics=("parallel", "arbitrary"),
            vmem_limit_bytes=_VMEM_LIMIT,
        ),
    )(x, w_enc_t, b_enc2d)

    # ---------------- phase 2: decoder  (grid = D_OUT tiles x batch tiles) -------------
    # batch innermost so the W_d block index is constant on the inner axis and
    # W_d streams from HBM exactly once.
    decoded = pl.pallas_call(
        _decoder_kernel,
        out_shape=jax.ShapeDtypeStruct((B, D_out), out_dtype),
        grid_spec=pltpu.PrefetchScalarGridSpec(
            num_scalar_prefetch=0,
            grid=(n_j, n_i),
            in_specs=[
                pl.BlockSpec((tb, HID), lambda j, i: (i, 0)),   # encoded tile
                pl.BlockSpec((HID, tn), lambda j, i: (0, j)),   # W_d tile
            ],
            out_specs=pl.BlockSpec((tb, tn), lambda j, i: (i, j)),
        ),
        compiler_params=pltpu.CompilerParams(
            dimension_semantics=("parallel", "parallel"),
            vmem_limit_bytes=_VMEM_LIMIT,
        ),
    )(encoded, w_dec_t)

    return encoded, decoded


if __name__ == "__main__":
    # Small stand-in dims consistent with the module's forward: two chained
    # linears, bias only on the encoder.  Deliberately NOT 8/128-aligned so the
    # ragged-tile paths used at the real sizes (D_IN=204354, HID=50,
    # D_OUT=34059) are exercised.
    B, D_IN, HID, D_OUT = 20, 1000, 50, 300

    key = jax.random.PRNGKey(0)
    kx, kwe, kbe, kwd = jax.random.split(key, 4)

    x = jax.random.normal(kx, (B, D_IN), dtype=jnp.float32)
    bound_e = 1.0 / jnp.sqrt(D_IN)
    bound_d = 1.0 / jnp.sqrt(HID)
    w_enc_t = jax.random.uniform(kwe, (D_IN, HID), jnp.float32, -bound_e, bound_e)  # W_e^T
    b_enc = jax.random.uniform(kbe, (HID,), jnp.float32, -bound_e, bound_e)
    w_dec_t = jax.random.uniform(kwd, (HID, D_OUT), jnp.float32, -bound_d, bound_d)  # W_d^T

    # One-time weight prep (cast to bf16), outside the per-call path.
    we_p, be_p, wd_p = prepare_params(w_enc_t, b_enc, w_dec_t)
    we_p, be_p, wd_p = jax.block_until_ready((we_p, be_p, wd_p))

    # 1) default tiles -> single full-dim blocks at these small shapes.
    fwd_default = jax.jit(autoencoder_forward)
    enc1, dec1 = fwd_default(x, we_p, be_p, wd_p)

    # 2) forced small tiles -> ragged batch / K (masked) / D_OUT boundary blocks.
    fwd_small = jax.jit(functools.partial(autoencoder_forward, tb=16, tk=384, tn=128))
    enc2, dec2 = fwd_small(x, we_p, be_p, wd_p)

    jax.block_until_ready((enc1, dec1, enc2, dec2))

    assert enc1.shape == (B, HID) and dec1.shape == (B, D_OUT)
    assert enc2.shape == (B, HID) and dec2.shape == (B, D_OUT)

    # Reference consistent with bf16 weight/activation streaming + f32 accumulation.
    xr = x.astype(jnp.bfloat16).astype(jnp.float32)
    wer = we_p.astype(jnp.float32)
    wdr = wd_p.astype(jnp.float32)
    enc_ref = jnp.dot(xr, wer, precision=jax.lax.Precision.HIGHEST) + b_enc[None, :]
    dec_ref = jnp.dot(enc_ref.astype(jnp.bfloat16).astype(jnp.float32), wdr,
                      precision=jax.lax.Precision.HIGHEST)

    for enc_out, dec_out in ((enc1, dec1), (enc2, dec2)):
        assert jnp.allclose(enc_out, enc_ref, atol=2e-3, rtol=2e-3)
        assert jnp.allclose(dec_out, dec_ref, atol=2e-3, rtol=2e-3)

    print("KERNEL_OK")
</pallas_src>

<mosaic_0001>
module attributes {stable_mosaic.version = 11 : i64} {
  func.func @_decoder_kernel(%arg0: i32, %arg1: i32, %arg2: memref<20x50xf32, #tpu.memory_space<vmem>>, %arg3: memref<50x300xbf16, #tpu.memory_space<vmem>>, %arg4: memref<20x300xf32, #tpu.memory_space<vmem>>) attributes {dimension_semantics = [#tpu.dimension_semantics<parallel>, #tpu.dimension_semantics<parallel>], iteration_bounds = array<i64: 1, 1>, scalar_prefetch = 0 : i64, scratch_operands = 0 : i64, tpu.core_type = #tpu.core_type<tc>, window_params = [{transform_indices = @transform_0, window_bounds = array<i64: 20, 50>}, {transform_indices = @transform_1, window_bounds = array<i64: 50, 300>}, {transform_indices = @transform_2, window_bounds = array<i64: 20, 300>}]} {
    %c0 = arith.constant 0 : index
    %c0_0 = arith.constant 0 : index
    %0 = vector.load %arg2[%c0, %c0_0] : memref<20x50xf32, #tpu.memory_space<vmem>>, vector<20x50xf32>
    %1 = arith.truncf %0 : vector<20x50xf32> to vector<20x50xbf16>
    %c0_1 = arith.constant 0 : index
    %c0_2 = arith.constant 0 : index
    %2 = vector.load %arg3[%c0_1, %c0_2] : memref<50x300xbf16, #tpu.memory_space<vmem>>, vector<50x300xbf16>
    %cst = arith.constant dense<0.000000e+00> : vector<20x300xf32>
    %3 = tpu.matmul %1, %2, %cst {dimension_numbers = #tpu.dot_dimension_numbers<[1], [0], [0], [1], [0, 0, 1, 1], [], []>} : vector<20x50xbf16>, vector<50x300xbf16>, vector<20x300xf32> -> vector<20x300xf32>
    %c0_3 = arith.constant 0 : index
    %c0_4 = arith.constant 0 : index
    %4 = vector.load %arg4[%c0_3, %c0_4] : memref<20x300xf32, #tpu.memory_space<vmem>>, vector<20x300xf32>
    tpu.vector_store %arg4[%c0_3, %c0_4], %3 {strides = array<i32>} : memref<20x300xf32, #tpu.memory_space<vmem>>, vector<20x300xf32>,
    return
  }
  func.func @transform_0(%arg0: i32, %arg1: i32) -> (i32, i32) {
    %c0_i32 = arith.constant 0 : i32
    %c0_i32_0 = arith.constant 0 : i32
    return %arg1, %c0_i32 : i32, i32
  }
  func.func @transform_1(%arg0: i32, %arg1: i32) -> (i32, i32) {
    %c0_i32 = arith.constant 0 : i32
    %c0_i32_0 = arith.constant 0 : i32
    return %c0_i32, %arg0 : i32, i32
  }
  func.func @transform_2(%arg0: i32, %arg1: i32) -> (i32, i32) {
    %c0_i32 = arith.constant 0 : i32
    return %arg1, %arg0 : i32, i32
  }
}

module attributes {stable_mosaic.version = 11 : i64} {
  func.func @_encoder_kernel(%arg0: i32, %arg1: i32, %arg2: memref<20x1000xf32, #tpu.memory_space<vmem>>, %arg3: memref<1000x50xbf16, #tpu.memory_space<vmem>>, %arg4: memref<1x50xf32, #tpu.memory_space<vmem>>, %arg5: memref<20x50xf32, #tpu.memory_space<vmem>>, %arg6: memref<20x50xf32, #tpu.memory_space<vmem>>) attributes {dimension_semantics = [#tpu.dimension_semantics<parallel>, #tpu.dimension_semantics<arbitrary>], iteration_bounds = array<i64: 1, 1>, scalar_prefetch = 0 : i64, scratch_operands = 1 : i64, tpu.core_type = #tpu.core_type<tc>, window_params = [{transform_indices = @transform_0, window_bounds = array<i64: 20, 1000>}, {transform_indices = @transform_1, window_bounds = array<i64: 1000, 50>}, {pipeline_mode = #tpu.pipeline_mode<synchronous>, transform_indices = @transform_2, window_bounds = array<i64: 1, 50>}, {transform_indices = @transform_3, window_bounds = array<i64: 20, 50>}]} {
    %c0_i32 = arith.constant 0 : i32
    %0 = arith.cmpi eq, %arg1, %c0_i32 : i32
    %1 = arith.extui %0 : i1 to i32
    %c0_i32_0 = arith.constant 0 : i32
    %2 = arith.cmpi ne, %1, %c0_i32_0 : i32
    scf.if %2 {
      %cst_10 = arith.constant 0.000000e+00 : f32
      %13 = vector.broadcast %cst_10 : f32 to vector<20x50xf32>
      %c0_11 = arith.constant 0 : index
      %c0_12 = arith.constant 0 : index
      %14 = vector.load %arg6[%c0_11, %c0_12] : memref<20x50xf32, #tpu.memory_space<vmem>>, vector<20x50xf32>
      tpu.vector_store %arg6[%c0_11, %c0_12], %13 {strides = array<i32>} : memref<20x50xf32, #tpu.memory_space<vmem>>, vector<20x50xf32>,
    } else {
    }
    %c0 = arith.constant 0 : index
    %c0_1 = arith.constant 0 : index
    %3 = vector.load %arg2[%c0, %c0_1] : memref<20x1000xf32, #tpu.memory_space<vmem>>, vector<20x1000xf32>
    %c0_2 = arith.constant 0 : index
    %c0_3 = arith.constant 0 : index
    %4 = vector.load %arg3[%c0_2, %c0_3] : memref<1000x50xbf16, #tpu.memory_space<vmem>>, vector<1000x50xbf16>
    %c0_4 = arith.constant 0 : index
    %c0_5 = arith.constant 0 : index
    %5 = vector.load %arg6[%c0_4, %c0_5] : memref<20x50xf32, #tpu.memory_space<vmem>>, vector<20x50xf32>
    %6 = arith.truncf %3 : vector<20x1000xf32> to vector<20x1000xbf16>
    %cst = arith.constant dense<0.000000e+00> : vector<20x50xf32>
    %7 = tpu.matmul %6, %4, %cst {dimension_numbers = #tpu.dot_dimension_numbers<[1], [0], [0], [1], [0, 0, 1, 1], [], []>} : vector<20x1000xbf16>, vector<1000x50xbf16>, vector<20x50xf32> -> vector<20x50xf32>
    %8 = arith.addf %5, %7 : vector<20x50xf32>
    %c0_6 = arith.constant 0 : index
    %c0_7 = arith.constant 0 : index
    %9 = vector.load %arg6[%c0_6, %c0_7] : memref<20x50xf32, #tpu.memory_space<vmem>>, vector<20x50xf32>
    tpu.vector_store %arg6[%c0_6, %c0_7], %8 {strides = array<i32>} : memref<20x50xf32, #tpu.memory_space<vmem>>, vector<20x50xf32>,
    %c0_i32_8 = arith.constant 0 : i32
    %10 = arith.cmpi eq, %arg1, %c0_i32_8 : i32
    %11 = arith.extui %10 : i1 to i32
    %c0_i32_9 = arith.constant 0 : i32
    %12 = arith.cmpi ne, %11, %c0_i32_9 : i32
    scf.if %12 {
      %c0_10 = arith.constant 0 : index
      %c0_11 = arith.constant 0 : index
      %13 = vector.load %arg6[%c0_10, %c0_11] : memref<20x50xf32, #tpu.memory_space<vmem>>, vector<20x50xf32>
      %c0_12 = arith.constant 0 : index
      %c0_13 = arith.constant 0 : index
      %14 = vector.load %arg4[%c0_12, %c0_13] : memref<1x50xf32, #tpu.memory_space<vmem>>, vector<1x50xf32>
      %15 = vector.broadcast %14 : vector<1x50xf32> to vector<20x50xf32>
      %16 = arith.addf %13, %15 : vector<20x50xf32>
      %c0_14 = arith.constant 0 : index
      %c0_15 = arith.constant 0 : index
      %17 = vector.load %arg5[%c0_14, %c0_15] : memref<20x50xf32, #tpu.memory_space<vmem>>, vector<20x50xf32>
      tpu.vector_store %arg5[%c0_14, %c0_15], %16 {strides = array<i32>} : memref<20x50xf32, #tpu.memory_space<vmem>>, vector<20x50xf32>,
    } else {
    }
    return
  }
  func.func @transform_0(%arg0: i32, %arg1: i32) -> (i32, i32) {
    %c0_i32 = arith.constant 0 : i32
    return %arg0, %arg1 : i32, i32
  }
  func.func @transform_1(%arg0: i32, %arg1: i32) -> (i32, i32) {
    %c0_i32 = arith.constant 0 : i32
    %c0_i32_0 = arith.constant 0 : i32
    return %arg1, %c0_i32 : i32, i32
  }
  func.func @transform_2(%arg0: i32, %arg1: i32) -> (i32, i32) {
    %c0_i32 = arith.constant 0 : i32
    %c0_i32_0 = arith.constant 0 : i32
    %c0_i32_1 = arith.constant 0 : i32
    return %c0_i32, %c0_i32_0 : i32, i32
  }
  func.func @transform_3(%arg0: i32, %arg1: i32) -> (i32, i32) {
    %c0_i32 = arith.constant 0 : i32
    %c0_i32_0 = arith.constant 0 : i32
    return %arg0, %c0_i32 : i32, i32
  }
}

</mosaic_0001>

<bundles_post_ra>
// kernel: autoencoder_forward.3
= control target key start
LH: loop header
LB: loop body
LE: loop exit
PB: predicated region body
PF: predicated region fallthrough
CT: control target
= control target key end

     0   :  { %vm95_vm0 = vcmask 1040384   ;;  %v308_v11 = vmov 0   ;;  %vm88_vm1 = vcmask 408576   ;;  %s376_s0 = inlined_call_operand.vmem [shape: f32[20,50], index: 0, kind: input, shape index: {}]   ;;  %s377_s1 = inlined_call_operand.vmem [shape: bf16[50,300], index: 1, kind: input, shape index: {}]   ;;  %s378_s2 = inlined_call_operand.hbm [shape: f32[20,300], index: 2, kind: output, shape index: {}]  }
   0x1   :  { %v30_v0 = vld [vmem:[%s377_s1 + $0x48] sm:$0x11]  ;;  %v272_v2 = vld [vmem:[%s377_s1 + $0x50] ss:$0 sps:$4 sm:$0x11]   ;;  %137 = vmatprep.mubr.bf16.mxu0 %v308_v11  ;;  %v13_v13 = vld [vmem:[%s376_s0] sm:$0xff] }
   0x2   :  { %v241_v1 = vcombine.high %v30_v0, %v30_v0  ;;  %v240_v3 = vcombine.low %v30_v0, %v30_v0  ;;  %v274_v4 = vld [vmem:[%s377_s1 + $0x34] ss:$12 sps:$4 sm:$0xff]   ;;  %v276_v5 = vld [vmem:[%s377_s1 + $0x38] ss:$12 sps:$4 sm:$0xff]   ;;  %266 = vmatprep.subr.msk.bf16.mxu1 %vm95_vm0, %v272_v2  ;;  %v103_v7 = vsel %vm95_vm0, %v272_v2, 0  ;;  %v14_v14 = vld [vmem:[%s376_s0 + $0x8] sm:$0xff] }
   0x3   :  { %255 = vmatpush3.bf16.msra.mxu1 %v103_v7  ;;  %v277_v8 = vld [vmem:[%s377_s1 + $0x30] ss:$12 sps:$4 sm:$0xff]   ;;  %v280_v10 = vld [vmem:[%s377_s1 + $0x20] ss:$12 sps:$4 sm:$0xff]   ;;  %v281_v12 = vld [vmem:[%s377_s1 + $0x18] ss:$12 sps:$4 sm:$0xff]   ;;  %v16_v17 = vpack.c.bf16 %v14_v14, %v13_v13 }
   0x4   :  { %243 = vmatprep.subr.msk.bf16.mxu0 %vm95_vm0, %v241_v1  ;;  %v97_v6 = vsel %vm95_vm0, %v240_v3, 0  ;;  %256 = vmatprep.subr.bf16.mxu1 %v276_v5  ;;  %v278_v9 = vld [vmem:[%s377_s1 + $0x1c] ss:$12 sps:$4 sm:$0xff]   ;;  %v282_v15 = vld [vmem:[%s377_s1 + $0x4] ss:$12 sps:$4 sm:$0xff]  }
   0x5   :  { %114 = vmatpush1.bf16.msra.mxu0 %v97_v6  ;;  %v284_v16 = vld [vmem:[%s377_s1 + $0x8] ss:$12 sps:$4 sm:$0xff]  }
   0x6   :  { %115 = vmatprep.subr.bf16.mxu0 %v274_v4 }
   0x7   :  { %257 = vmatpush3.bf16.msra.mxu1 %v276_v5 }
   0x8   :  { %258 = vmatprep.subr.bf16.mxu1 %v280_v10 }
   0x9   :  { %116 = vmatpush1.bf16.msra.mxu0 %v277_v8 }
   0xa   :  { %117 = vmatprep.subr.bf16.mxu0 %v278_v9 }
   0xb   :  { %7 = vsyncpa [#allocation3], 0  ;;  %262 = vmatprep.mubr.msk.bf16.mxu1 %vm88_vm1, %v16_v17  ;;  %259 = vmatpush3.bf16.msra.mxu1 %v280_v10  ;;  %v285_v18 = vld [vmem:[%s377_s1] ss:$12 sps:$4 sm:$0xff]   ;;  %v15_v19 = vld [vmem:[%s376_s0 + $0x10] sm:$0xf] }
   0xc   :  { %260 = vmatprep.subr.bf16.mxu1 %v284_v16  ;;  %v17_v20 = vpack.c.bf16 %v15_v19, %v15_v19  ;;  %vm213_vm2 = vcmask 355328   ;;  %vm206_vm3 = vcmask 359424   ;;  %s309_s0 = smov [#allocation2]  }
   0xd   :  { %118 = vmatpush1.bf16.msra.mxu0 %v281_v12  ;;  %s220_s1 = sshll.u32 %s309_s0, 4  ;;  %s221_s1 = int_to_ptr.vmem [resolvable:$true] %s220_s1 }
   0xe   :  { %119 = vmatprep.subr.bf16.mxu0 %v282_v15  ;;  %s286_s9 = scalar_lea.vmem %s221_s1, 1152  ;;  %p291_p1 = scmp.lt.s32.totalorder %s221_s1, %s221_s1 }
   0xf   :  { %261 = vmatpush3.bf16.msra.mxu1 %v284_v16  ;;  %p287_p0 = scmp.ne.s32.totalorder %s221_s1, %s286_s9  ;;  %p292_p2 = scmp.lt.s32.totalorder %s286_s9, %s286_s9 }
  0x11   :  { %120 = vmatpush1.bf16.msra.mxu0 %v285_v18  ;;  %p293_p3 = por %p292_p2, %p291_p1 }
  0x12   :  { %263 = vmatmul.mubr.msk.bf16.vlgmr.msra.gmra.mxu1 %vm88_vm1, %v17_v20 }
  0x13   :  { %p294_p4 = pnand %p293_p3, %p287_p0 }
  0x14   :  { %244 = vmatmul.mubr.msk.bf16.vlgmr.msra.gmra.mxu0 %vm88_vm1, %v16_v17 }
  0x15   :  { %147 = vmatprep.mubr.bf16.mxu0 %v308_v11 }
  0x1c   :  { %245 = vmatmul.mubr.msk.bf16.gmra.mxu0 %vm88_vm1, %v17_v20 }
  0xd2   :  { %v264_v22 = vpop.f32.mrf.mxu1 }
  0xd3   :  { %214 = vst.msk [vmem:[#allocation2 + $0x40] sm:$0xf] %vm213_vm2, %v264_v22 }
  0xd4   :  { %v139_v21 = vpop.f32.mrf.mxu0  ;;  %v190_v24 = vpop.f32.mrf.mxu1 }
  0xd5   :  { %204 = vst [vmem:[#allocation2] sm:$0xff] %v139_v21  ;;  %207 = vst.msk [vmem:[#allocation2 + $0x10] sm:$0xff] %vm206_vm3, %v190_v24 }
  0xd6   :  { %v141_v23 = vpop.f32.mrf.mxu0  ;;  %v265_v26 = vpop.f32.mrf.mxu1 }
  0xd7   :  { %205 = vst [vmem:[#allocation2 + $0x8] sm:$0xff] %v141_v23 }
  0xd8   :  { %v143_v25 = vpop.f32.mrf.mxu0  ;;  %v193_v28 = vpop.f32.mrf.mxu1 }
  0xd9   :  { %208 = vst [vmem:[#allocation2 + $0x18] sm:$0xff] %v143_v25  ;;  %210 = vst.msk [vmem:[#allocation2 + $0x28] sm:$0xff] %vm206_vm3, %v193_v28 }
  0xda   :  { %v145_v27 = vpop.f32.mrf.mxu0 }
  0xdb   :  { %209 = vst [vmem:[#allocation2 + $0x20] sm:$0xff] %v145_v27 }
  0xdc   :  { %v149_v29 = vpop.f32.mrf.mxu0 }
  0xdd   :  { %211 = vst [vmem:[#allocation2 + $0x30] sm:$0xf] %v149_v29 }
  0xde   :  { %v151_v30 = vpop.f32.mrf.mxu0 }
  0xdf   :  { %212 = vst [vmem:[#allocation2 + $0x38] sm:$0xf] %v151_v30 }
  0xe0   :  { %v153_v31 = vpop.f32.mrf.mxu0 }
  0xe1   :  { %297 = shalt.err (!%p294_p4)
}
  0xe2   :  { %s310_s10 = smov 384   ;;  %s311_s11 = smov 24   ;;  %v154_v32 = vpop.f32.mrf.mxu0 }
  0xe3   :  { %226 = dma.vmem_to_hbm [thread:$0]  %s221_s1, 1152, %s378_s2, [#allocation3], %s310_s10, %s310_s10, %s311_s11  }
  0xe4   :  { %306 = dma.done.wait [#allocation3], 1152  }
  0xe5   :  { %307 = vsyncadd [#allocation3], 4294966144 }
  0xe6   :  { %230 = vsyncpa [#allocation3], 1 }

// kernel: autoencoder_forward.2
= control target key start
LH: loop header
LB: loop body
LE: loop exit
PB: predicated region body
PF: predicated region fallthrough
CT: control target
= control target key end

     0   :  { %v1016_v43 = vmov 0   ;;  %vm574_vm0 = vcmask 1043456   ;;  %vm567_vm1 = vcmask 850944   ;;  %vm19_vm2 = vcmask 408576   ;;  %s1337_s1 = inlined_call_operand.vmem [shape: bf16[1000,50], index: 1, kind: input, shape index: {}]   ;;  %s1338_s0 = inlined_call_operand.vmem [shape: f32[20,1000], index: 0, kind: input, shape index: {}]   ;;  %s1339_s2 = inlined_call_operand.vmem [shape: f32[1,50], index: 2, kind: input, shape index: {}]   ;;  %s1340_s3 = inlined_call_operand.vmem [shape: f32[20,50], index: 3, kind: output, shape index: {}]  }
   0x1   :  { %v953_v0 = vld [vmem:[%s1337_s1 + $0x78] sm:$0xff]   ;;  %v957_v4 = vld [vmem:[%s1337_s1 + $0x70] sm:$0xff]   ;;  %v961_v8 = vld [vmem:[%s1337_s1 + $0x68] sm:$0xff]   ;;  %vm22_vm3 = vcmask 404480  }
   0x2   :  { %v954_v1 = vld [vmem:[%s1337_s1 + $0xf8] sm:$0xff]   ;;  %867 = vmatprep.subr.bf16.mxu0 %v953_v0  ;;  %v958_v5 = vld [vmem:[%s1337_s1 + $0xf0] sm:$0xff]   ;;  %v962_v9 = vld [vmem:[%s1337_s1 + $0xe8] sm:$0xff]  }
   0x3   :  { %v955_v2 = vld [vmem:[%s1337_s1 + $0x38] sm:$0xff]   ;;  %895 = vmatprep.subr.bf16.mxu1 %v954_v1  ;;  %v959_v6 = vld [vmem:[%s1337_s1 + $0x30] sm:$0xff]   ;;  %v963_v10 = vld [vmem:[%s1337_s1 + $0x28] sm:$0xff]  }
   0x4   :  { %v956_v3 = vld [vmem:[%s1337_s1 + $0xb8] sm:$0xff]   ;;  %868 = vmatpush3.bf16.msra.mxu0 %v955_v2  ;;  %v960_v7 = vld [vmem:[%s1337_s1 + $0xb0] sm:$0xff]   ;;  %v964_v11 = vld [vmem:[%s1337_s1 + $0xa8] sm:$0xff]  }
   0x5   :  { %896 = vmatpush3.bf16.msra.mxu1 %v956_v3  ;;  %869 = vmatprep.subr.bf16.mxu0 %v957_v4  ;;  %v965_v12 = vld [vmem:[%s1337_s1 + $0x60] sm:$0xff]   ;;  %v969_v16 = vld [vmem:[%s1337_s1 + $0x58] sm:$0xff]   ;;  %v973_v20 = vld [vmem:[%s1337_s1 + $0x50] sm:$0xff]  }
   0x6   :  { %897 = vmatprep.subr.bf16.mxu1 %v958_v5  ;;  %v966_v13 = vld [vmem:[%s1337_s1 + $0xe0] sm:$0xff]   ;;  %v970_v17 = vld [vmem:[%s1337_s1 + $0xd8] sm:$0xff]   ;;  %v974_v21 = vld [vmem:[%s1337_s1 + $0xd0] sm:$0xff]  }
   0x7   :  { %v967_v14 = vld [vmem:[%s1337_s1 + $0x20] sm:$0xff]   ;;  %v971_v18 = vld [vmem:[%s1337_s1 + $0x18] sm:$0xff]   ;;  %v975_v22 = vld [vmem:[%s1337_s1 + $0x10] sm:$0xff]  }
   0x8   :  { %870 = vmatpush3.bf16.msra.mxu0 %v959_v6  ;;  %v968_v15 = vld [vmem:[%s1337_s1 + $0xa0] sm:$0xff]   ;;  %v972_v19 = vld [vmem:[%s1337_s1 + $0x98] sm:$0xff]   ;;  %v976_v23 = vld [vmem:[%s1337_s1 + $0x90] sm:$0xff]  }
   0x9   :  { %898 = vmatpush3.bf16.msra.mxu1 %v960_v7  ;;  %871 = vmatprep.subr.bf16.mxu0 %v961_v8  ;;  %v977_v24 = vld [vmem:[%s1337_s1 + $0x48] sm:$0xff]   ;;  %v981_v28 = vld [vmem:[%s1337_s1 + $0x40] sm:$0xff]   ;;  %v27_v34 = vld [vmem:[%s1338_s0 + $0x18] sm:$0xff] }
   0xa   :  { %899 = vmatprep.subr.bf16.mxu1 %v962_v9  ;;  %v978_v25 = vld [vmem:[%s1337_s1 + $0xc8] sm:$0xff]   ;;  %v982_v29 = vld [vmem:[%s1337_s1 + $0xc0] sm:$0xff]   ;;  %v35_v36 = vld [vmem:[%s1338_s0 + $0x58] sm:$0xff] }
   0xb   :  { %v979_v26 = vld [vmem:[%s1337_s1 + $0x8] sm:$0xff]   ;;  %v983_v30 = vld [vmem:[%s1337_s1] sm:$0xff]   ;;  %v179_v39 = vpack.c.bf16 %v35_v36, %v27_v34  ;;  %v26_v41 = vld [vmem:[%s1338_s0 + $0x10] sm:$0xff] }
   0xc   :  { %872 = vmatpush3.bf16.msra.mxu0 %v963_v10  ;;  %v980_v27 = vld [vmem:[%s1337_s1 + $0x88] sm:$0xff]   ;;  %v984_v31 = vld [vmem:[%s1337_s1 + $0x80] sm:$0xff]   ;;  %v34_v42 = vld [vmem:[%s1338_s0 + $0x50] sm:$0xff] }
   0xd   :  { %900 = vmatpush3.bf16.msra.mxu1 %v964_v11  ;;  %873 = vmatprep.subr.bf16.mxu0 %v965_v12  ;;  %v25_v32 = vld [vmem:[%s1338_s0 + $0x8] sm:$0xff]  ;;  %v24_v37 = vld [vmem:[%s1338_s0] sm:$0xff]  ;;  %v178_v44 = vpack.c.bf16 %v34_v42, %v26_v41  ;;  %v985_v45 = vld [vmem:[%s1337_s1 + $0x178] sm:$0xff]   ;;  %v1017_v41 = vmov 0.0  }
   0xe   :  { %901 = vmatprep.subr.bf16.mxu1 %v966_v13  ;;  %v33_v33 = vld [vmem:[%s1338_s0 + $0x48] sm:$0xff]  ;;  %v32_v38 = vld [vmem:[%s1338_s0 + $0x40] sm:$0xff]  ;;  %658 = vmatprep.mubr.bf16.mxu1 %v179_v39  ;;  %v986_v46 = vld [vmem:[%s1337_s1 + $0x138] sm:$0xff]   ;;  %20 = vst.msk [vmem:[#allocation2] sm:$0xff] %vm19_vm2, %v1017_v41 }
   0xf   :  { %v177_v35 = vpack.c.bf16 %v33_v33, %v25_v32  ;;  %v176_v40 = vpack.c.bf16 %v32_v38, %v24_v37  ;;  %v987_v47 = vld [vmem:[%s1337_s1 + $0x1b8] sm:$0xff]   ;;  %v988_v48 = vld [vmem:[%s1337_s1 + $0x170] sm:$0xff]   ;;  %v991_v51 = vld [vmem:[%s1337_s1 + $0x168] sm:$0xff]   ;;  %21 = vst.msk [vmem:[#allocation2 + $0x8] sm:$0xff] %vm19_vm2, %v1017_v41 }
  0x10   :  { %874 = vmatpush3.bf16.msra.mxu0 %v967_v14  ;;  %v989_v49 = vld [vmem:[%s1337_s1 + $0x130] sm:$0xff]   ;;  %v992_v52 = vld [vmem:[%s1337_s1 + $0x128] sm:$0xff]   ;;  %v994_v54 = vld [vmem:[%s1337_s1 + $0x160] sm:$0xff]   ;;  %23 = vst.msk [vmem:[#allocation2 + $0x10] sm:$0xf] %vm22_vm3, %v1017_v41 }
  0x11   :  { %902 = vmatpush3.bf16.msra.mxu1 %v968_v15  ;;  %875 = vmatprep.subr.bf16.mxu0 %v969_v16  ;;  %v990_v50 = vld [vmem:[%s1337_s1 + $0x1b0] sm:$0xff]   ;;  %v993_v53 = vld [vmem:[%s1337_s1 + $0x1a8] sm:$0xff]   ;;  %v995_v55 = vld [vmem:[%s1337_s1 + $0x120] sm:$0xff]  }
  0x12   :  { %903 = vmatprep.subr.bf16.mxu1 %v970_v17  ;;  %610 = vmatprep.mubr.bf16.mxu0 %v177_v35  ;;  %v996_v56 = vld [vmem:[%s1337_s1 + $0x1a0] sm:$0xff]   ;;  %v997_v57 = vld [vmem:[%s1337_s1 + $0x158] sm:$0xff]   ;;  %v1000_v60 = vld [vmem:[%s1337_s1 + $0x150] sm:$0xff]  }
  0x13   :  { %v998_v58 = vld [vmem:[%s1337_s1 + $0x118] sm:$0xff]   ;;  %v1001_v61 = vld [vmem:[%s1337_s1 + $0x110] sm:$0xff]   ;;  %v41_v62 = vld [vmem:[%s1338_s0 + $0x88] sm:$0xf] }
  0x14   :  { %876 = vmatpush3.bf16.msra.mxu0 %v971_v18  ;;  %v999_v59 = vld [vmem:[%s1337_s1 + $0x198] sm:$0xff]   ;;  %v185_v63 = vpack.c.bf16 %v41_v62, %v41_v62  ;;  %v40_v0 = vld [vmem:[%s1338_s0 + $0x80] sm:$0xf]  ;;  %v1002_v1 = vld [vmem:[%s1337_s1 + $0x190] sm:$0xff]  }
  0x15   :  { %904 = vmatpush3.bf16.msra.mxu1 %v972_v19  ;;  %877 = vmatprep.subr.bf16.mxu0 %v973_v20  ;;  %v184_v2 = vpack.c.bf16 %v40_v0, %v40_v0  ;;  %v1003_v3 = vld [vmem:[%s1337_s1 + $0x148] sm:$0xff]   ;;  %v1006_v6 = vld [vmem:[%s1337_s1 + $0x140] sm:$0xff]   ;;  %v1009_v14 = vld [vmem:[%s1337_s1 + $0x1f0] ss:$0 sps:$4 sm:$0xff]  }
  0x16   :  { %905 = vmatprep.subr.bf16.mxu1 %v974_v21  ;;  %v1004_v4 = vld [vmem:[%s1337_s1 + $0x108] sm:$0xff]   ;;  %v1007_v9 = vld [vmem:[%s1337_s1 + $0x100] sm:$0xff]   ;;  %v43_v15 = vld [vmem:[%s1338_s0 + $0x98] sm:$0xf] }
  0x17   :  { %v1005_v5 = vld [vmem:[%s1337_s1 + $0x188] sm:$0xff]   ;;  %v1008_v11 = vld [vmem:[%s1337_s1 + $0x180] sm:$0xff]   ;;  %v42_v16 = vld [vmem:[%s1338_s0 + $0x90] sm:$0xf]  ;;  %v187_v17 = vpack.c.bf16 %v43_v15, %v43_v15 }
  0x18   :  { %878 = vmatpush3.bf16.msra.mxu0 %v975_v22  ;;  %v29_v7 = vld [vmem:[%s1338_s0 + $0x28] sm:$0xff]  ;;  %v28_v12 = vld [vmem:[%s1338_s0 + $0x20] sm:$0xff]  ;;  %v186_v18 = vpack.c.bf16 %v42_v16, %v42_v16  ;;  %v576_v22 = vsel %vm574_vm0, %v1009_v14, 0  ;;  %v30_v34 = vld [vmem:[%s1338_s0 + $0x30] sm:$0xff] }
  0x19   :  { %906 = vmatpush3.bf16.msra.mxu1 %v976_v23  ;;  %879 = vmatprep.subr.bf16.mxu0 %v977_v24  ;;  %v37_v8 = vld [vmem:[%s1338_s0 + $0x68] sm:$0xff]  ;;  %v36_v13 = vld [vmem:[%s1338_s0 + $0x60] sm:$0xff]  ;;  %v31_v23 = vld [vmem:[%s1338_s0 + $0x38] sm:$0xff] }
  0x1a   :  { %907 = vmatprep.subr.bf16.mxu1 %v978_v25  ;;  %v181_v10 = vpack.c.bf16 %v37_v8, %v29_v7  ;;  %v45_v19 = vld [vmem:[%s1338_s0 + $0xa8] sm:$0xf]  ;;  %v180_v20 = vpack.c.bf16 %v36_v13, %v28_v12  ;;  %v39_v24 = vld [vmem:[%s1338_s0 + $0x78] sm:$0xff]  ;;  %v44_v25 = vld [vmem:[%s1338_s0 + $0xa0] sm:$0xf] }
  0x1b   :  { %v189_v21 = vpack.c.bf16 %v45_v19, %v45_v19  ;;  %v1014_v32 = vld [vmem:[%s1337_s1 + $0x1c8] sm:$0xff]   ;;  %v1015_v33 = vld [vmem:[%s1337_s1 + $0x1c0] sm:$0xff]   ;;  %v38_v35 = vld [vmem:[%s1338_s0 + $0x70] sm:$0xff] }
  0x1c   :  { %880 = vmatpush3.bf16.msra.mxu0 %v979_v26  ;;  %v183_v26 = vpack.c.bf16 %v39_v24, %v31_v23  ;;  %v47_v36 = vld [vmem:[%s1338_s0 + $0xb8] sm:$0xf]  ;;  %v182_v37 = vpack.c.bf16 %v38_v35, %v30_v34  ;;  %v46_v39 = vld [vmem:[%s1338_s0 + $0xb0] sm:$0xf]  ;;  %v173_v12 = vld [vmem:[#allocation2] sm:$0xff] }
  0x1d   :  { %908 = vmatpush3.bf16.msra.mxu1 %v980_v27  ;;  %881 = vmatprep.subr.bf16.mxu0 %v981_v28  ;;  %v1010_v27 = vld [vmem:[%s1337_s1 + $0x1e8] sm:$0xff]   ;;  %v188_v28 = vpack.c.bf16 %v44_v25, %v44_v25  ;;  %v191_v38 = vpack.c.bf16 %v47_v36, %v47_v36 }
  0x1e   :  { %909 = vmatprep.subr.bf16.mxu1 %v982_v29  ;;  %v1011_v29 = vld [vmem:[%s1337_s1 + $0x1e0] sm:$0xff]  }
  0x20   :  { %882 = vmatpush3.bf16.msra.mxu0 %v983_v30  ;;  %v1012_v30 = vld [vmem:[%s1337_s1 + $0x1d8] sm:$0xff]  }
  0x21   :  { %910 = vmatpush3.bf16.msra.mxu1 %v984_v31  ;;  %923 = vmatprep.subr.bf16.mxu0 %v985_v45  ;;  %v1013_v31 = vld [vmem:[%s1337_s1 + $0x1d0] sm:$0xff]  }
  0x22   :  { %722 = vmatprep.subr.bf16.mxu1 %v1016_v43 }
  0x23   :  { %611 = vmatmul.mubr.bf16.vlgmr.msra.gmra.mxu0 %v176_v40  ;;  %v190_v40 = vpack.c.bf16 %v46_v39, %v46_v39 }
  0x24   :  { %659 = vmatmul.mubr.bf16.vlgmr.msra.gmra.mxu1 %v178_v44  ;;  %924 = vmatpush3.bf16.msra.mxu0 %v986_v46 }
  0x25   :  { %723 = vmatpush1.bf16.msra.mxu1 %v987_v47  ;;  %925 = vmatprep.subr.bf16.mxu0 %v988_v48 }
  0x26   :  { %724 = vmatprep.subr.bf16.mxu1 %v1016_v43  ;;  %618 = vmatprep.mubr.bf16.mxu0 %v185_v63 }
  0x27   :  { %666 = vmatprep.mubr.bf16.mxu1 %v187_v17 }
  0x28   :  { %926 = vmatpush3.bf16.msra.mxu0 %v989_v49 }
  0x29   :  { %725 = vmatpush1.bf16.msra.mxu1 %v990_v50  ;;  %927 = vmatprep.subr.bf16.mxu0 %v991_v51 }
  0x2a   :  { %726 = vmatprep.subr.bf16.mxu1 %v1016_v43 }
  0x2b   :  { %619 = vmatmul.mubr.bf16.gmra.mxu0 %v184_v2 }
  0x2c   :  { %928 = vmatpush3.bf16.msra.mxu0 %v992_v52  ;;  %706 = vmatprep.mubr.bf16.mxu0 %v181_v10 }
  0x2d   :  { %727 = vmatpush1.bf16.msra.mxu1 %v993_v53  ;;  %929 = vmatprep.subr.bf16.mxu0 %v994_v54 }
  0x2e   :  { %728 = vmatprep.subr.bf16.mxu1 %v1016_v43  ;;  %667 = vmatmul.mubr.bf16.gmra.mxu1 %v186_v18 }
  0x2f   :  { %864 = vmatprep.mubr.msk.bf16.mxu1 %vm567_vm1, %v183_v26 }
  0x30   :  { %930 = vmatpush3.bf16.msra.mxu0 %v995_v55 }
  0x31   :  { %729 = vmatpush1.bf16.msra.mxu1 %v996_v56  ;;  %931 = vmatprep.subr.bf16.mxu0 %v997_v57 }
  0x32   :  { %730 = vmatprep.subr.bf16.mxu1 %v1016_v43 }
  0x34   :  { %932 = vmatpush3.bf16.msra.mxu0 %v998_v58 }
  0x35   :  { %731 = vmatpush1.bf16.msra.mxu1 %v999_v59  ;;  %933 = vmatprep.subr.bf16.mxu0 %v1000_v60 }
  0x36   :  { %732 = vmatprep.subr.bf16.mxu1 %v1016_v43 }
  0x38   :  { %934 = vmatpush3.bf16.msra.mxu0 %v1001_v61 }
  0x39   :  { %733 = vmatpush1.bf16.msra.mxu1 %v1002_v1  ;;  %935 = vmatprep.subr.bf16.mxu0 %v1003_v3 }
  0x3a   :  { %734 = vmatprep.subr.bf16.mxu1 %v1016_v43 }
  0x3c   :  { %936 = vmatpush3.bf16.msra.mxu0 %v1004_v4 }
  0x3d   :  { %735 = vmatpush1.bf16.msra.mxu1 %v1005_v5  ;;  %937 = vmatprep.subr.bf16.mxu0 %v1006_v6 }
  0x3e   :  { %736 = vmatprep.subr.bf16.mxu1 %v1016_v43 }
  0x40   :  { %938 = vmatpush3.bf16.msra.mxu0 %v1007_v9 }
  0x41   :  { %737 = vmatpush1.bf16.msra.mxu1 %v1008_v11 }
  0x42   :  { %740 = vmatprep.subr.bf16.mxu1 %v1016_v43 }
  0x43   :  { %707 = vmatmul.mubr.bf16.vlgmr.msra.gmra.mxu0 %v180_v20 }
  0x44   :  { %714 = vmatprep.mubr.bf16.mxu0 %v189_v21  ;;  %v174_v21 = vld [vmem:[#allocation2 + $0x8] sm:$0xff] }
  0x45   :  { %741 = vmatpush2.bf16.msra.mxu1 %v576_v22 }
  0x46   :  { %742 = vmatprep.subr.bf16.mxu1 %v1016_v43 }
  0x49   :  { %743 = vmatpush2.bf16.msra.mxu1 %v1010_v27  ;;  %v175_v27 = vld [vmem:[#allocation2 + $0x10] sm:$0xf] }
  0x4a   :  { %744 = vmatprep.subr.bf16.mxu1 %v1016_v43 }
  0x4b   :  { %715 = vmatmul.mubr.bf16.gmra.mxu0 %v188_v28 }
  0x4d   :  { %745 = vmatpush2.bf16.msra.mxu1 %v1011_v29 }
  0x4e   :  { %746 = vmatprep.subr.bf16.mxu1 %v1016_v43 }
  0x51   :  { %747 = vmatpush2.bf16.msra.mxu1 %v1012_v30  ;;  %v866_v30 = vld [vmem:[%s1339_s2] ss:$0 sm:$0xff] }
  0x52   :  { %748 = vmatprep.subr.bf16.mxu1 %v1016_v43 }
  0x55   :  { %749 = vmatpush2.bf16.msra.mxu1 %v1013_v31 }
  0x56   :  { %750 = vmatprep.subr.bf16.mxu1 %v1016_v43 }
  0x59   :  { %751 = vmatpush2.bf16.msra.mxu1 %v1014_v32 }
  0x5a   :  { %752 = vmatprep.subr.bf16.mxu1 %v1016_v43 }
  0x5d   :  { %753 = vmatpush2.bf16.msra.mxu1 %v1015_v33 }
  0x60   :  { %755 = vmatmul.mubr.bf16.vlgmr.msra.gmra.mxu1 %v182_v37 }
  0x61   :  { %865 = vmatprep.mubr.msk.bf16.mxu1 %vm567_vm1, %v191_v38 }
  0x68   :  { %763 = vmatmul.mubr.bf16.gmra.mxu1 %v190_v40 }
  0xe3   :  { %v883_v42 = vpop.f32.mrf.mxu0 }
  0xe4   :  { %v911_v45 = vpop.f32.mrf.mxu1 }
  0xe5   :  { %v884_v43 = vpop.f32.mrf.mxu0 }
  0xe6   :  { %v912_v48 = vpop.f32.mrf.mxu1  ;;  %v885_v2 = vadd.f32 %v884_v43, %v883_v42 }
  0xe7   :  { %v886_v44 = vpop.f32.mrf.mxu0  ;;  %v913_v3 = vadd.f32 %v912_v48, %v911_v45 }
  0xe8   :  { %v914_v51 = vpop.f32.mrf.mxu1 }
  0xe9   :  { %v887_v46 = vpop.f32.mrf.mxu0  ;;  %v661_v5 = vadd.f32 %v913_v3, %v885_v2 }
  0xea   :  { %v915_v53 = vpop.f32.mrf.mxu1  ;;  %v888_v6 = vadd.f32 %v887_v46, %v886_v44 }
  0xeb   :  { %v889_v47 = vpop.f32.mrf.mxu0  ;;  %v916_v7 = vadd.f32 %v915_v53, %v914_v51 }
  0xed   :  { %v890_v49 = vpop.f32.mrf.mxu0  ;;  %v664_v14 = vadd.f32 %v916_v7, %v888_v6 }
  0xee   :  { %v917_v54 = vpop.f32.mrf.mxu1  ;;  %v891_v8 = vadd.f32 %v890_v49, %v889_v47 }
  0xef   :  { %v892_v50 = vpop.f32.mrf.mxu0 }
  0xf0   :  { %v918_v56 = vpop.f32.mrf.mxu1 }
  0xf1   :  { %v893_v52 = vpop.f32.mrf.mxu0  ;;  %v919_v10 = vadd.f32 %v918_v56, %v917_v54 }
  0xf2   :  { %v920_v58 = vpop.f32.mrf.mxu1 }
  0xf3   :  { %v669_v17 = vadd.f32 %v919_v10, %v891_v8 }
  0xf4   :  { %v921_v60 = vpop.f32.mrf.mxu1 }
 0x103   :  { %v939_v55 = vpop.f32.mrf.mxu0 }
 0x105   :  { %v940_v57 = vpop.f32.mrf.mxu0 }
 0x106   :  { %v941_v4 = vadd.f32 %v940_v57, %v939_v55 }
 0x107   :  { %v942_v59 = vpop.f32.mrf.mxu0 }
 0x108   :  { %v709_v11 = vadd.f32 %v941_v4, %v661_v5 }
 0x109   :  { %v943_v61 = vpop.f32.mrf.mxu0 }
 0x10a   :  { %v944_v9 = vadd.f32 %v943_v61, %v942_v59 }
 0x10b   :  { %v945_v62 = vpop.f32.mrf.mxu0 }
 0x10c   :  { %v712_v20 = vadd.f32 %v944_v9, %v664_v14 }
 0x10d   :  { %v946_v63 = vpop.f32.mrf.mxu0 }
 0x10e   :  { %v947_v18 = vadd.f32 %v946_v63, %v945_v62 }
 0x10f   :  { %v948_v0 = vpop.f32.mrf.mxu0 }
 0x110   :  { %v717_v26 = vadd.f32 %v947_v18, %v669_v17 }
 0x111   :  { %v949_v1 = vpop.f32.mrf.mxu0 }
 0x120   :  { %v756_v13 = vpop.f32.mrf.mxu1 }
 0x121   :  { %v757_v15 = vadd.f32 %v756_v13, %v709_v11 }
 0x122   :  { %v758_v16 = vpop.f32.mrf.mxu1 }
 0x123   :  { %v770_v19 = vadd.f32 %v757_v15, %v173_v12 }
 0x124   :  { %v759_v22 = vpop.f32.mrf.mxu1 }
 0x125   :  { %774 = vst.msk [vmem:[#allocation2] sm:$0xff] %vm19_vm2, %v770_v19  ;;  %v760_v23 = vadd.f32 %v759_v22, %v712_v20 }
 0x126   :  { %v761_v24 = vpop.f32.mrf.mxu1 }
 0x127   :  { %v771_v25 = vadd.f32 %v760_v23, %v174_v21 }
 0x128   :  { %v764_v28 = vpop.f32.mrf.mxu1 }
 0x129   :  { %775 = vst.msk [vmem:[#allocation2 + $0x8] sm:$0xff] %vm19_vm2, %v771_v25  ;;  %v765_v29 = vadd.f32 %v764_v28, %v717_v26 }
 0x12a   :  { %v766_v31 = vpop.f32.mrf.mxu1 }
 0x12b   :  { %v772_v32 = vadd.f32 %v765_v29, %v175_v27 }
 0x12c   :  { %v781_v33 = vld [vmem:[#allocation2] sm:$0xff]  ;;  %v767_v34 = vpop.f32.mrf.mxu1 }
 0x12d   :  { %777 = vst.msk [vmem:[#allocation2 + $0x10] sm:$0xf] %vm22_vm3, %v772_v32  ;;  %v791_v35 = vadd.f32 %v866_v30, %v781_v33 }
 0x12e   :  { %v768_v36 = vpop.f32.mrf.mxu1 }
 0x12f   :  { %794 = vst.msk [vmem:[%s1340_s3] sm:$0xff] %vm19_vm2, %v791_v35 }
 0x130   :  { %v782_v37 = vld [vmem:[#allocation2 + $0x8] sm:$0xff] }
 0x131   :  { %v792_v38 = vadd.f32 %v866_v30, %v782_v37 }
 0x133   :  { %795 = vst.msk [vmem:[%s1340_s3 + $0x8] sm:$0xff] %vm19_vm2, %v792_v38 }
 0x134   :  { %v783_v39 = vld [vmem:[#allocation2 + $0x10] sm:$0xf] }
 0x135   :  { %v793_v40 = vadd.f32 %v866_v30, %v783_v39 }
 0x137   :  { %796 = vst.msk [vmem:[%s1340_s3 + $0x10] sm:$0xf] %vm22_vm3, %v793_v40 }

</bundles_post_ra>
